<compile_context>
chip_gen: v7x
topology: tpu7x:2x2x1
jax: 0.10.0
libtpu: 0.0.40
codegen_flags: <defaults>
</compile_context>

<pallas_src>
import jax
import jax.numpy as jnp
from jax.experimental import pallas as pl
from jax.experimental.pallas import tpu as pltpu


def _cov_mc_ce_kernel(i_ref, m_ref, ltp_ref, r_ref, o_ref):
    g = pl.program_id(0)
    r = r_ref[...]                       # (S, C) bf16 Monte-Carlo samples (shared)
    rhs = ltp_ref[0]                     # (C, TB*C) bf16: TB packed L^T factors
    m_all = m_ref[0]                     # (TB, C) f32 mean logits

    TB, C = m_all.shape
    S = r.shape[0]

    # Single fat-N MXU matmul: d_all[s, t*C + c] = sum_j r[s, j] * L[t][c, j]
    d_all = jnp.dot(r, rhs, preferred_element_type=jnp.float32)    # (S, TB*C) f32

    # Hoisted out of the batch-tile loop (same iota for every t).
    col = jax.lax.broadcasted_iota(jnp.int32, (S, C), 1)

    for t in range(TB):                  # static, trace-time unrolled
        # lane-block slice at a 128-multiple offset -> free vreg selection
        logits = m_all[t:t + 1, :] + d_all[:, t * C:(t + 1) * C]   # (S, C)

        # cross_entropy(logits, tgt) = logsumexp(logits, -1) - logits[:, tgt]
        mmax = jnp.max(logits, axis=-1, keepdims=True)             # (S, 1)
        lse = mmax + jnp.log(jnp.sum(jnp.exp(logits - mmax), axis=-1, keepdims=True))
        tgt = i_ref[g * TB + t]          # scalar int32 target (SMEM prefetch)
        tlogit = jnp.sum(jnp.where(col == tgt, logits, 0.0), axis=-1, keepdims=True)
        ce = lse - tlogit                                           # (S, 1)

        # mean over samples first, then lane-broadcast the scalar for a dense store
        loss = jnp.mean(ce, axis=0, keepdims=True)                  # (1, 1)
        o_ref[t:t + 1, :] = jnp.broadcast_to(loss, (1, C)).astype(o_ref.dtype)


def cov_monte_carlo_cross_entropy_loss(m, k, target, r, *, batch_tile=8):
    """Forward of CovMonteCarloCrossEntropyLoss.

    m:      (B, C) float32 mean logits
    k:      (B, C, C) float32 PSD covariance, or None
    target: (B,) int class indices
    r:      (S, C) float32 standard normal samples (S = config['num_samples'])
    """
    if k is None:
        # No-covariance fallback: plain cross entropy (cheap glue, not the hot path).
        lse = jax.scipy.special.logsumexp(m, axis=-1)
        return lse - jnp.take_along_axis(m, target[:, None], axis=-1)[:, 0]

    B, C = m.shape
    S = r.shape[0]

    # TODO(synk): Cholesky factorization is sequential / data-dependent; kept in XLA.
    l = jnp.linalg.cholesky(k)                     # (B, C, C) lower triangular, f32

    TB = batch_tile if B > batch_tile else B       # keep TB a multiple of 8 (or == B)
    G = pl.cdiv(B, TB)
    Bp = G * TB
    tgt = target.astype(jnp.int32)
    if Bp != B:                                    # pad ragged batch (padding discarded)
        m = jnp.pad(m, ((0, Bp - B), (0, 0)))
        l = jnp.pad(l, ((0, Bp - B), (0, 0), (0, 0)))
        tgt = jnp.pad(tgt, (0, Bp - B))

    # Pack TB batches' L^T side-by-side along the MXU N axis:
    #   ltp[g, j, t*C + c] = L[g*TB + t][c, j]
    # The transpose + pack rides along with the bf16 cast in a single HBM pass
    # (no separate f32 transpose pass as in v1).
    ltp = (l.reshape(G, TB, C, C)
             .transpose(0, 3, 1, 2)
             .reshape(G, C, TB * C)
             .astype(jnp.bfloat16))
    m3 = m.reshape(G, TB, C).astype(jnp.float32)
    r_bf = r.astype(jnp.bfloat16)

    out = pl.pallas_call(
        _cov_mc_ce_kernel,
        out_shape=jax.ShapeDtypeStruct((Bp, C), jnp.float32),
        grid_spec=pltpu.PrefetchScalarGridSpec(
            num_scalar_prefetch=1,                 # targets land in SMEM
            grid=(G,),
            in_specs=[
                pl.BlockSpec((1, TB, C), lambda g, i: (g, 0, 0)),        # m
                pl.BlockSpec((1, C, TB * C), lambda g, i: (g, 0, 0)),    # packed L^T
                pl.BlockSpec((S, C), lambda g, i: (0, 0)),               # r (shared)
            ],
            out_specs=pl.BlockSpec((TB, C), lambda g, i: (g, 0)),
        ),
        compiler_params=pltpu.CompilerParams(dimension_semantics=("parallel",)),
    )(tgt, m3, ltp, r_bf)
    return out[:B, 0]


if __name__ == "__main__":
    B, C, S = 16, 128, 8          # batch, num classes, config['num_samples']
    key = jax.random.PRNGKey(0)
    k_m, k_a, k_i, k_r = jax.random.split(key, 4)

    m = jax.random.normal(k_m, (B, C), jnp.float32)
    a = 0.1 * jax.random.normal(k_a, (B, C, C), jnp.float32)
    k_cov = a @ jnp.swapaxes(a, -1, -2) + 1e-3 * jnp.eye(C, dtype=jnp.float32)  # PSD
    target = jax.random.randint(k_i, (B,), 0, C, jnp.int32)
    # torch.randn equivalent: noise drawn deterministically outside the kernel
    r = jax.random.normal(k_r, (S, C), jnp.float32)

    loss = jax.block_until_ready(cov_monte_carlo_cross_entropy_loss(m, k_cov, target, r))

    # Pure-JAX reference using the same bf16-rounded matmul operands (f32 accumulation),
    # so the comparison isolates kernel correctness rather than bf16 rounding.
    l = jnp.linalg.cholesky(k_cov)
    l_bf = l.astype(jnp.bfloat16).astype(jnp.float32)
    r_bf = r.astype(jnp.bfloat16).astype(jnp.float32)
    d = jnp.einsum("bcj,sj->sbc", l_bf, r_bf, precision=jax.lax.Precision.HIGHEST)
    logits = m[None] + d                                        # (S, B, C)
    lse = jax.scipy.special.logsumexp(logits, axis=-1)          # (S, B)
    idx = jnp.broadcast_to(target[None, :], (S, B))[..., None]
    tl = jnp.take_along_axis(logits, idx, axis=-1)[..., 0]      # (S, B)
    ref = jnp.mean(lse - tl, axis=0)                            # (B,)

    assert jnp.allclose(loss, ref, atol=2e-3, rtol=2e-3), (loss, ref)
    print("KERNEL_OK")
</pallas_src>

<mosaic_0001>
module attributes {stable_mosaic.version = 11 : i64} {
  func.func @_cov_mc_ce_kernel(%arg0: i32, %arg1: memref<16xi32, #tpu.memory_space<smem>>, %arg2: memref<1x8x128xf32, #tpu.memory_space<vmem>>, %arg3: memref<1x128x1024xbf16, #tpu.memory_space<vmem>>, %arg4: memref<8x128xbf16, #tpu.memory_space<vmem>>, %arg5: memref<8x128xf32, #tpu.memory_space<vmem>>) attributes {dimension_semantics = [#tpu.dimension_semantics<parallel>], iteration_bounds = array<i64: 2>, scalar_prefetch = 1 : i64, scratch_operands = 0 : i64, tpu.core_type = #tpu.core_type<tc>, window_params = [{transform_indices = @transform_0, window_bounds = array<i64: 1, 8, 128>}, {transform_indices = @transform_1, window_bounds = array<i64: 1, 128, 1024>}, {pipeline_mode = #tpu.pipeline_mode<synchronous>, transform_indices = @transform_2, window_bounds = array<i64: 8, 128>}, {transform_indices = @transform_3, window_bounds = array<i64: 8, 128>}]} {
    %c0 = arith.constant 0 : index
    %c0_0 = arith.constant 0 : index
    %0 = vector.load %arg4[%c0, %c0_0] : memref<8x128xbf16, #tpu.memory_space<vmem>>, vector<8x128xbf16>
    %c0_1 = arith.constant 0 : index
    %c0_2 = arith.constant 0 : index
    %c0_3 = arith.constant 0 : index
    %1 = vector.load %arg3[%c0_1, %c0_2, %c0_3] : memref<1x128x1024xbf16, #tpu.memory_space<vmem>>, vector<1x128x1024xbf16>
    %2 = vector.shape_cast %1 : vector<1x128x1024xbf16> to vector<128x1024xbf16>
    %c0_4 = arith.constant 0 : index
    %c0_5 = arith.constant 0 : index
    %c0_6 = arith.constant 0 : index
    %3 = vector.load %arg2[%c0_4, %c0_5, %c0_6] : memref<1x8x128xf32, #tpu.memory_space<vmem>>, vector<1x8x128xf32>
    %4 = vector.shape_cast %3 : vector<1x8x128xf32> to vector<8x128xf32>
    %cst = arith.constant dense<0.000000e+00> : vector<8x1024xf32>
    %5 = tpu.matmul %0, %2, %cst {dimension_numbers = #tpu.dot_dimension_numbers<[1], [0], [0], [1], [0, 0, 1, 1], [], []>} : vector<8x128xbf16>, vector<128x1024xbf16>, vector<8x1024xf32> -> vector<8x1024xf32>
    %6 = tpu.iota {dimensions = array<i32: 1>} : vector<8x128xi32>
    %7 = vector.extract_strided_slice %4 {offsets = [0, 0], sizes = [1, 128], strides = [1, 1]} : vector<8x128xf32> to vector<1x128xf32>
    %8 = vector.extract_strided_slice %5 {offsets = [0, 0], sizes = [8, 128], strides = [1, 1]} : vector<8x1024xf32> to vector<8x128xf32>
    %9 = vector.broadcast %7 : vector<1x128xf32> to vector<8x128xf32>
    %10 = arith.addf %9, %8 : vector<8x128xf32>
    %cst_7 = arith.constant dense<0xFF800000> : vector<8xf32>
    %11 = vector.multi_reduction <maximumf>, %10, %cst_7 [1] : vector<8x128xf32> to vector<8xf32>
    %12 = vector.shape_cast %11 : vector<8xf32> to vector<8x1xf32>
    %13 = vector.broadcast %12 : vector<8x1xf32> to vector<8x128xf32>
    %14 = arith.subf %10, %13 : vector<8x128xf32>
    %15 = math.exp %14 : vector<8x128xf32>
    %cst_8 = arith.constant dense<0.000000e+00> : vector<8xf32>
    %16 = vector.multi_reduction <add>, %15, %cst_8 [1] : vector<8x128xf32> to vector<8xf32>
    %17 = vector.shape_cast %16 : vector<8xf32> to vector<8x1xf32>
    %18 = math.log %17 : vector<8x1xf32>
    %19 = arith.addf %12, %18 : vector<8x1xf32>
    %c8_i32 = arith.constant 8 : i32
    %20 = arith.muli %arg0, %c8_i32 : i32
    %c0_i32 = arith.constant 0 : i32
    %21 = arith.addi %20, %c0_i32 : i32
    %22 = arith.index_cast %21 : i32 to index
    %23 = memref.load %arg1[%22] : memref<16xi32, #tpu.memory_space<smem>>
    %24 = vector.broadcast %23 : i32 to vector<8x128xi32>
    %25 = arith.cmpi eq, %6, %24 : vector<8x128xi32>
    %cst_9 = arith.constant 0.000000e+00 : f32
    %26 = vector.broadcast %cst_9 : f32 to vector<8x128xf32>
    %27 = arith.select %25, %10, %26 : vector<8x128xi1>, vector<8x128xf32>
    %cst_10 = arith.constant dense<0.000000e+00> : vector<8xf32>
    %28 = vector.multi_reduction <add>, %27, %cst_10 [1] : vector<8x128xf32> to vector<8xf32>
    %29 = vector.shape_cast %28 : vector<8xf32> to vector<8x1xf32>
    %30 = arith.subf %19, %29 : vector<8x1xf32>
    %cst_11 = arith.constant dense<0.000000e+00> : vector<1xf32>
    %31 = vector.multi_reduction <add>, %30, %cst_11 [0] : vector<8x1xf32> to vector<1xf32>
    %32 = vector.shape_cast %31 : vector<1xf32> to vector<1x1xf32>
    %cst_12 = arith.constant 8.000000e+00 : f32
    %33 = vector.broadcast %cst_12 : f32 to vector<1x1xf32>
    %34 = arith.divf %32, %33 : vector<1x1xf32>
    %35 = vector.shape_cast %34 : vector<1x1xf32> to vector<1x1xf32>
    %36 = vector.broadcast %35 : vector<1x1xf32> to vector<1x128xf32>
    %c0_13 = arith.constant 0 : index
    %c0_14 = arith.constant 0 : index
    %37 = vector.load %arg5[%c0_13, %c0_14] : memref<8x128xf32, #tpu.memory_space<vmem>>, vector<1x128xf32>
    tpu.vector_store %arg5[%c0_13, %c0_14], %36 {strides = array<i32>} : memref<8x128xf32, #tpu.memory_space<vmem>>, vector<1x128xf32>,
    %38 = vector.extract_strided_slice %4 {offsets = [1, 0], sizes = [1, 128], strides = [1, 1]} : vector<8x128xf32> to vector<1x128xf32>
    %39 = vector.extract_strided_slice %5 {offsets = [0, 128], sizes = [8, 128], strides = [1, 1]} : vector<8x1024xf32> to vector<8x128xf32>
    %40 = vector.broadcast %38 : vector<1x128xf32> to vector<8x128xf32>
    %41 = arith.addf %40, %39 : vector<8x128xf32>
    %cst_15 = arith.constant dense<0xFF800000> : vector<8xf32>
    %42 = vector.multi_reduction <maximumf>, %41, %cst_15 [1] : vector<8x128xf32> to vector<8xf32>
    %43 = vector.shape_cast %42 : vector<8xf32> to vector<8x1xf32>
    %44 = vector.broadcast %43 : vector<8x1xf32> to vector<8x128xf32>
    %45 = arith.subf %41, %44 : vector<8x128xf32>
    %46 = math.exp %45 : vector<8x128xf32>
    %cst_16 = arith.constant dense<0.000000e+00> : vector<8xf32>
    %47 = vector.multi_reduction <add>, %46, %cst_16 [1] : vector<8x128xf32> to vector<8xf32>
    %48 = vector.shape_cast %47 : vector<8xf32> to vector<8x1xf32>
    %49 = math.log %48 : vector<8x1xf32>
    %50 = arith.addf %43, %49 : vector<8x1xf32>
    %c8_i32_17 = arith.constant 8 : i32
    %51 = arith.muli %arg0, %c8_i32_17 : i32
    %c1_i32 = arith.constant 1 : i32
    %52 = arith.addi %51, %c1_i32 : i32
    %53 = arith.index_cast %52 : i32 to index
    %54 = memref.load %arg1[%53] : memref<16xi32, #tpu.memory_space<smem>>
    %55 = vector.broadcast %54 : i32 to vector<8x128xi32>
    %56 = arith.cmpi eq, %6, %55 : vector<8x128xi32>
    %cst_18 = arith.constant 0.000000e+00 : f32
    %57 = vector.broadcast %cst_18 : f32 to vector<8x128xf32>
    %58 = arith.select %56, %41, %57 : vector<8x128xi1>, vector<8x128xf32>
    %cst_19 = arith.constant dense<0.000000e+00> : vector<8xf32>
    %59 = vector.multi_reduction <add>, %58, %cst_19 [1] : vector<8x128xf32> to vector<8xf32>
    %60 = vector.shape_cast %59 : vector<8xf32> to vector<8x1xf32>
    %61 = arith.subf %50, %60 : vector<8x1xf32>
    %cst_20 = arith.constant dense<0.000000e+00> : vector<1xf32>
    %62 = vector.multi_reduction <add>, %61, %cst_20 [0] : vector<8x1xf32> to vector<1xf32>
    %63 = vector.shape_cast %62 : vector<1xf32> to vector<1x1xf32>
    %cst_21 = arith.constant 8.000000e+00 : f32
    %64 = vector.broadcast %cst_21 : f32 to vector<1x1xf32>
    %65 = arith.divf %63, %64 : vector<1x1xf32>
    %66 = vector.shape_cast %65 : vector<1x1xf32> to vector<1x1xf32>
    %67 = vector.broadcast %66 : vector<1x1xf32> to vector<1x128xf32>
    %c1 = arith.constant 1 : index
    %c0_22 = arith.constant 0 : index
    %68 = vector.load %arg5[%c1, %c0_22] : memref<8x128xf32, #tpu.memory_space<vmem>>, vector<1x128xf32>
    tpu.vector_store %arg5[%c1, %c0_22], %67 {strides = array<i32>} : memref<8x128xf32, #tpu.memory_space<vmem>>, vector<1x128xf32>,
    %69 = vector.extract_strided_slice %4 {offsets = [2, 0], sizes = [1, 128], strides = [1, 1]} : vector<8x128xf32> to vector<1x128xf32>
    %70 = vector.extract_strided_slice %5 {offsets = [0, 256], sizes = [8, 128], strides = [1, 1]} : vector<8x1024xf32> to vector<8x128xf32>
    %71 = vector.broadcast %69 : vector<1x128xf32> to vector<8x128xf32>
    %72 = arith.addf %71, %70 : vector<8x128xf32>
    %cst_23 = arith.constant dense<0xFF800000> : vector<8xf32>
    %73 = vector.multi_reduction <maximumf>, %72, %cst_23 [1] : vector<8x128xf32> to vector<8xf32>
    %74 = vector.shape_cast %73 : vector<8xf32> to vector<8x1xf32>
    %75 = vector.broadcast %74 : vector<8x1xf32> to vector<8x128xf32>
    %76 = arith.subf %72, %75 : vector<8x128xf32>
    %77 = math.exp %76 : vector<8x128xf32>
    %cst_24 = arith.constant dense<0.000000e+00> : vector<8xf32>
    %78 = vector.multi_reduction <add>, %77, %cst_24 [1] : vector<8x128xf32> to vector<8xf32>
    %79 = vector.shape_cast %78 : vector<8xf32> to vector<8x1xf32>
    %80 = math.log %79 : vector<8x1xf32>
    %81 = arith.addf %74, %80 : vector<8x1xf32>
    %c8_i32_25 = arith.constant 8 : i32
    %82 = arith.muli %arg0, %c8_i32_25 : i32
    %c2_i32 = arith.constant 2 : i32
    %83 = arith.addi %82, %c2_i32 : i32
    %84 = arith.index_cast %83 : i32 to index
    %85 = memref.load %arg1[%84] : memref<16xi32, #tpu.memory_space<smem>>
    %86 = vector.broadcast %85 : i32 to vector<8x128xi32>
    %87 = arith.cmpi eq, %6, %86 : vector<8x128xi32>
    %cst_26 = arith.constant 0.000000e+00 : f32
    %88 = vector.broadcast %cst_26 : f32 to vector<8x128xf32>
    %89 = arith.select %87, %72, %88 : vector<8x128xi1>, vector<8x128xf32>
    %cst_27 = arith.constant dense<0.000000e+00> : vector<8xf32>
    %90 = vector.multi_reduction <add>, %89, %cst_27 [1] : vector<8x128xf32> to vector<8xf32>
    %91 = vector.shape_cast %90 : vector<8xf32> to vector<8x1xf32>
    %92 = arith.subf %81, %91 : vector<8x1xf32>
    %cst_28 = arith.constant dense<0.000000e+00> : vector<1xf32>
    %93 = vector.multi_reduction <add>, %92, %cst_28 [0] : vector<8x1xf32> to vector<1xf32>
    %94 = vector.shape_cast %93 : vector<1xf32> to vector<1x1xf32>
    %cst_29 = arith.constant 8.000000e+00 : f32
    %95 = vector.broadcast %cst_29 : f32 to vector<1x1xf32>
    %96 = arith.divf %94, %95 : vector<1x1xf32>
    %97 = vector.shape_cast %96 : vector<1x1xf32> to vector<1x1xf32>
    %98 = vector.broadcast %97 : vector<1x1xf32> to vector<1x128xf32>
    %c2 = arith.constant 2 : index
    %c0_30 = arith.constant 0 : index
    %99 = vector.load %arg5[%c2, %c0_30] : memref<8x128xf32, #tpu.memory_space<vmem>>, vector<1x128xf32>
    tpu.vector_store %arg5[%c2, %c0_30], %98 {strides = array<i32>} : memref<8x128xf32, #tpu.memory_space<vmem>>, vector<1x128xf32>,
    %100 = vector.extract_strided_slice %4 {offsets = [3, 0], sizes = [1, 128], strides = [1, 1]} : vector<8x128xf32> to vector<1x128xf32>
    %101 = vector.extract_strided_slice %5 {offsets = [0, 384], sizes = [8, 128], strides = [1, 1]} : vector<8x1024xf32> to vector<8x128xf32>
    %102 = vector.broadcast %100 : vector<1x128xf32> to vector<8x128xf32>
    %103 = arith.addf %102, %101 : vector<8x128xf32>
    %cst_31 = arith.constant dense<0xFF800000> : vector<8xf32>
    %104 = vector.multi_reduction <maximumf>, %103, %cst_31 [1] : vector<8x128xf32> to vector<8xf32>
    %105 = vector.shape_cast %104 : vector<8xf32> to vector<8x1xf32>
    %106 = vector.broadcast %105 : vector<8x1xf32> to vector<8x128xf32>
    %107 = arith.subf %103, %106 : vector<8x128xf32>
    %108 = math.exp %107 : vector<8x128xf32>
    %cst_32 = arith.constant dense<0.000000e+00> : vector<8xf32>
    %109 = vector.multi_reduction <add>, %108, %cst_32 [1] : vector<8x128xf32> to vector<8xf32>
    %110 = vector.shape_cast %109 : vector<8xf32> to vector<8x1xf32>
    %111 = math.log %110 : vector<8x1xf32>
    %112 = arith.addf %105, %111 : vector<8x1xf32>
    %c8_i32_33 = arith.constant 8 : i32
    %113 = arith.muli %arg0, %c8_i32_33 : i32
    %c3_i32 = arith.constant 3 : i32
    %114 = arith.addi %113, %c3_i32 : i32
    %115 = arith.index_cast %114 : i32 to index
    %116 = memref.load %arg1[%115] : memref<16xi32, #tpu.memory_space<smem>>
    %117 = vector.broadcast %116 : i32 to vector<8x128xi32>
    %118 = arith.cmpi eq, %6, %117 : vector<8x128xi32>
    %cst_34 = arith.constant 0.000000e+00 : f32
    %119 = vector.broadcast %cst_34 : f32 to vector<8x128xf32>
    %120 = arith.select %118, %103, %119 : vector<8x128xi1>, vector<8x128xf32>
    %cst_35 = arith.constant dense<0.000000e+00> : vector<8xf32>
    %121 = vector.multi_reduction <add>, %120, %cst_35 [1] : vector<8x128xf32> to vector<8xf32>
    %122 = vector.shape_cast %121 : vector<8xf32> to vector<8x1xf32>
    %123 = arith.subf %112, %122 : vector<8x1xf32>
    %cst_36 = arith.constant dense<0.000000e+00> : vector<1xf32>
    %124 = vector.multi_reduction <add>, %123, %cst_36 [0] : vector<8x1xf32> to vector<1xf32>
    %125 = vector.shape_cast %124 : vector<1xf32> to vector<1x1xf32>
    %cst_37 = arith.constant 8.000000e+00 : f32
    %126 = vector.broadcast %cst_37 : f32 to vector<1x1xf32>
    %127 = arith.divf %125, %126 : vector<1x1xf32>
    %128 = vector.shape_cast %127 : vector<1x1xf32> to vector<1x1xf32>
    %129 = vector.broadcast %128 : vector<1x1xf32> to vector<1x128xf32>
    %c3 = arith.constant 3 : index
    %c0_38 = arith.constant 0 : index
    %130 = vector.load %arg5[%c3, %c0_38] : memref<8x128xf32, #tpu.memory_space<vmem>>, vector<1x128xf32>
    tpu.vector_store %arg5[%c3, %c0_38], %129 {strides = array<i32>} : memref<8x128xf32, #tpu.memory_space<vmem>>, vector<1x128xf32>,
    %131 = vector.extract_strided_slice %4 {offsets = [4, 0], sizes = [1, 128], strides = [1, 1]} : vector<8x128xf32> to vector<1x128xf32>
    %132 = vector.extract_strided_slice %5 {offsets = [0, 512], sizes = [8, 128], strides = [1, 1]} : vector<8x1024xf32> to vector<8x128xf32>
    %133 = vector.broadcast %131 : vector<1x128xf32> to vector<8x128xf32>
    %134 = arith.addf %133, %132 : vector<8x128xf32>
    %cst_39 = arith.constant dense<0xFF800000> : vector<8xf32>
    %135 = vector.multi_reduction <maximumf>, %134, %cst_39 [1] : vector<8x128xf32> to vector<8xf32>
    %136 = vector.shape_cast %135 : vector<8xf32> to vector<8x1xf32>
    %137 = vector.broadcast %136 : vector<8x1xf32> to vector<8x128xf32>
    %138 = arith.subf %134, %137 : vector<8x128xf32>
    %139 = math.exp %138 : vector<8x128xf32>
    %cst_40 = arith.constant dense<0.000000e+00> : vector<8xf32>
    %140 = vector.multi_reduction <add>, %139, %cst_40 [1] : vector<8x128xf32> to vector<8xf32>
    %141 = vector.shape_cast %140 : vector<8xf32> to vector<8x1xf32>
    %142 = math.log %141 : vector<8x1xf32>
    %143 = arith.addf %136, %142 : vector<8x1xf32>
    %c8_i32_41 = arith.constant 8 : i32
    %144 = arith.muli %arg0, %c8_i32_41 : i32
    %c4_i32 = arith.constant 4 : i32
    %145 = arith.addi %144, %c4_i32 : i32
    %146 = arith.index_cast %145 : i32 to index
    %147 = memref.load %arg1[%146] : memref<16xi32, #tpu.memory_space<smem>>
    %148 = vector.broadcast %147 : i32 to vector<8x128xi32>
    %149 = arith.cmpi eq, %6, %148 : vector<8x128xi32>
    %cst_42 = arith.constant 0.000000e+00 : f32
    %150 = vector.broadcast %cst_42 : f32 to vector<8x128xf32>
    %151 = arith.select %149, %134, %150 : vector<8x128xi1>, vector<8x128xf32>
    %cst_43 = arith.constant dense<0.000000e+00> : vector<8xf32>
    %152 = vector.multi_reduction <add>, %151, %cst_43 [1] : vector<8x128xf32> to vector<8xf32>
    %153 = vector.shape_cast %152 : vector<8xf32> to vector<8x1xf32>
    %154 = arith.subf %143, %153 : vector<8x1xf32>
    %cst_44 = arith.constant dense<0.000000e+00> : vector<1xf32>
    %155 = vector.multi_reduction <add>, %154, %cst_44 [0] : vector<8x1xf32> to vector<1xf32>
    %156 = vector.shape_cast %155 : vector<1xf32> to vector<1x1xf32>
    %cst_45 = arith.constant 8.000000e+00 : f32
    %157 = vector.broadcast %cst_45 : f32 to vector<1x1xf32>
    %158 = arith.divf %156, %157 : vector<1x1xf32>
    %159 = vector.shape_cast %158 : vector<1x1xf32> to vector<1x1xf32>
    %160 = vector.broadcast %159 : vector<1x1xf32> to vector<1x128xf32>
    %c4 = arith.constant 4 : index
    %c0_46 = arith.constant 0 : index
    %161 = vector.load %arg5[%c4, %c0_46] : memref<8x128xf32, #tpu.memory_space<vmem>>, vector<1x128xf32>
    tpu.vector_store %arg5[%c4, %c0_46], %160 {strides = array<i32>} : memref<8x128xf32, #tpu.memory_space<vmem>>, vector<1x128xf32>,
    %162 = vector.extract_strided_slice %4 {offsets = [5, 0], sizes = [1, 128], strides = [1, 1]} : vector<8x128xf32> to vector<1x128xf32>
    %163 = vector.extract_strided_slice %5 {offsets = [0, 640], sizes = [8, 128], strides = [1, 1]} : vector<8x1024xf32> to vector<8x128xf32>
    %164 = vector.broadcast %162 : vector<1x128xf32> to vector<8x128xf32>
    %165 = arith.addf %164, %163 : vector<8x128xf32>
    %cst_47 = arith.constant dense<0xFF800000> : vector<8xf32>
    %166 = vector.multi_reduction <maximumf>, %165, %cst_47 [1] : vector<8x128xf32> to vector<8xf32>
    %167 = vector.shape_cast %166 : vector<8xf32> to vector<8x1xf32>
    %168 = vector.broadcast %167 : vector<8x1xf32> to vector<8x128xf32>
    %169 = arith.subf %165, %168 : vector<8x128xf32>
    %170 = math.exp %169 : vector<8x128xf32>
    %cst_48 = arith.constant dense<0.000000e+00> : vector<8xf32>
    %171 = vector.multi_reduction <add>, %170, %cst_48 [1] : vector<8x128xf32> to vector<8xf32>
    %172 = vector.shape_cast %171 : vector<8xf32> to vector<8x1xf32>
    %173 = math.log %172 : vector<8x1xf32>
    %174 = arith.addf %167, %173 : vector<8x1xf32>
    %c8_i32_49 = arith.constant 8 : i32
    %175 = arith.muli %arg0, %c8_i32_49 : i32
    %c5_i32 = arith.constant 5 : i32
    %176 = arith.addi %175, %c5_i32 : i32
    %177 = arith.index_cast %176 : i32 to index
    %178 = memref.load %arg1[%177] : memref<16xi32, #tpu.memory_space<smem>>
    %179 = vector.broadcast %178 : i32 to vector<8x128xi32>
    %180 = arith.cmpi eq, %6, %179 : vector<8x128xi32>
    %cst_50 = arith.constant 0.000000e+00 : f32
    %181 = vector.broadcast %cst_50 : f32 to vector<8x128xf32>
    %182 = arith.select %180, %165, %181 : vector<8x128xi1>, vector<8x128xf32>
    %cst_51 = arith.constant dense<0.000000e+00> : vector<8xf32>
    %183 = vector.multi_reduction <add>, %182, %cst_51 [1] : vector<8x128xf32> to vector<8xf32>
    %184 = vector.shape_cast %183 : vector<8xf32> to vector<8x1xf32>
    %185 = arith.subf %174, %184 : vector<8x1xf32>
    %cst_52 = arith.constant dense<0.000000e+00> : vector<1xf32>
    %186 = vector.multi_reduction <add>, %185, %cst_52 [0] : vector<8x1xf32> to vector<1xf32>
    %187 = vector.shape_cast %186 : vector<1xf32> to vector<1x1xf32>
    %cst_53 = arith.constant 8.000000e+00 : f32
    %188 = vector.broadcast %cst_53 : f32 to vector<1x1xf32>
    %189 = arith.divf %187, %188 : vector<1x1xf32>
    %190 = vector.shape_cast %189 : vector<1x1xf32> to vector<1x1xf32>
    %191 = vector.broadcast %190 : vector<1x1xf32> to vector<1x128xf32>
    %c5 = arith.constant 5 : index
    %c0_54 = arith.constant 0 : index
    %192 = vector.load %arg5[%c5, %c0_54] : memref<8x128xf32, #tpu.memory_space<vmem>>, vector<1x128xf32>
    tpu.vector_store %arg5[%c5, %c0_54], %191 {strides = array<i32>} : memref<8x128xf32, #tpu.memory_space<vmem>>, vector<1x128xf32>,
    %193 = vector.extract_strided_slice %4 {offsets = [6, 0], sizes = [1, 128], strides = [1, 1]} : vector<8x128xf32> to vector<1x128xf32>
    %194 = vector.extract_strided_slice %5 {offsets = [0, 768], sizes = [8, 128], strides = [1, 1]} : vector<8x1024xf32> to vector<8x128xf32>
    %195 = vector.broadcast %193 : vector<1x128xf32> to vector<8x128xf32>
    %196 = arith.addf %195, %194 : vector<8x128xf32>
    %cst_55 = arith.constant dense<0xFF800000> : vector<8xf32>
    %197 = vector.multi_reduction <maximumf>, %196, %cst_55 [1] : vector<8x128xf32> to vector<8xf32>
    %198 = vector.shape_cast %197 : vector<8xf32> to vector<8x1xf32>
    %199 = vector.broadcast %198 : vector<8x1xf32> to vector<8x128xf32>
    %200 = arith.subf %196, %199 : vector<8x128xf32>
    %201 = math.exp %200 : vector<8x128xf32>
    %cst_56 = arith.constant dense<0.000000e+00> : vector<8xf32>
    %202 = vector.multi_reduction <add>, %201, %cst_56 [1] : vector<8x128xf32> to vector<8xf32>
    %203 = vector.shape_cast %202 : vector<8xf32> to vector<8x1xf32>
    %204 = math.log %203 : vector<8x1xf32>
    %205 = arith.addf %198, %204 : vector<8x1xf32>
    %c8_i32_57 = arith.constant 8 : i32
    %206 = arith.muli %arg0, %c8_i32_57 : i32
    %c6_i32 = arith.constant 6 : i32
    %207 = arith.addi %206, %c6_i32 : i32
    %208 = arith.index_cast %207 : i32 to index
    %209 = memref.load %arg1[%208] : memref<16xi32, #tpu.memory_space<smem>>
    %210 = vector.broadcast %209 : i32 to vector<8x128xi32>
    %211 = arith.cmpi eq, %6, %210 : vector<8x128xi32>
    %cst_58 = arith.constant 0.000000e+00 : f32
    %212 = vector.broadcast %cst_58 : f32 to vector<8x128xf32>
    %213 = arith.select %211, %196, %212 : vector<8x128xi1>, vector<8x128xf32>
    %cst_59 = arith.constant dense<0.000000e+00> : vector<8xf32>
    %214 = vector.multi_reduction <add>, %213, %cst_59 [1] : vector<8x128xf32> to vector<8xf32>
    %215 = vector.shape_cast %214 : vector<8xf32> to vector<8x1xf32>
    %216 = arith.subf %205, %215 : vector<8x1xf32>
    %cst_60 = arith.constant dense<0.000000e+00> : vector<1xf32>
    %217 = vector.multi_reduction <add>, %216, %cst_60 [0] : vector<8x1xf32> to vector<1xf32>
    %218 = vector.shape_cast %217 : vector<1xf32> to vector<1x1xf32>
    %cst_61 = arith.constant 8.000000e+00 : f32
    %219 = vector.broadcast %cst_61 : f32 to vector<1x1xf32>
    %220 = arith.divf %218, %219 : vector<1x1xf32>
    %221 = vector.shape_cast %220 : vector<1x1xf32> to vector<1x1xf32>
    %222 = vector.broadcast %221 : vector<1x1xf32> to vector<1x128xf32>
    %c6 = arith.constant 6 : index
    %c0_62 = arith.constant 0 : index
    %223 = vector.load %arg5[%c6, %c0_62] : memref<8x128xf32, #tpu.memory_space<vmem>>, vector<1x128xf32>
    tpu.vector_store %arg5[%c6, %c0_62], %222 {strides = array<i32>} : memref<8x128xf32, #tpu.memory_space<vmem>>, vector<1x128xf32>,
    %224 = vector.extract_strided_slice %4 {offsets = [7, 0], sizes = [1, 128], strides = [1, 1]} : vector<8x128xf32> to vector<1x128xf32>
    %225 = vector.extract_strided_slice %5 {offsets = [0, 896], sizes = [8, 128], strides = [1, 1]} : vector<8x1024xf32> to vector<8x128xf32>
    %226 = vector.broadcast %224 : vector<1x128xf32> to vector<8x128xf32>
    %227 = arith.addf %226, %225 : vector<8x128xf32>
    %cst_63 = arith.constant dense<0xFF800000> : vector<8xf32>
    %228 = vector.multi_reduction <maximumf>, %227, %cst_63 [1] : vector<8x128xf32> to vector<8xf32>
    %229 = vector.shape_cast %228 : vector<8xf32> to vector<8x1xf32>
    %230 = vector.broadcast %229 : vector<8x1xf32> to vector<8x128xf32>
    %231 = arith.subf %227, %230 : vector<8x128xf32>
    %232 = math.exp %231 : vector<8x128xf32>
    %cst_64 = arith.constant dense<0.000000e+00> : vector<8xf32>
    %233 = vector.multi_reduction <add>, %232, %cst_64 [1] : vector<8x128xf32> to vector<8xf32>
    %234 = vector.shape_cast %233 : vector<8xf32> to vector<8x1xf32>
    %235 = math.log %234 : vector<8x1xf32>
    %236 = arith.addf %229, %235 : vector<8x1xf32>
    %c8_i32_65 = arith.constant 8 : i32
    %237 = arith.muli %arg0, %c8_i32_65 : i32
    %c7_i32 = arith.constant 7 : i32
    %238 = arith.addi %237, %c7_i32 : i32
    %239 = arith.index_cast %238 : i32 to index
    %240 = memref.load %arg1[%239] : memref<16xi32, #tpu.memory_space<smem>>
    %241 = vector.broadcast %240 : i32 to vector<8x128xi32>
    %242 = arith.cmpi eq, %6, %241 : vector<8x128xi32>
    %cst_66 = arith.constant 0.000000e+00 : f32
    %243 = vector.broadcast %cst_66 : f32 to vector<8x128xf32>
    %244 = arith.select %242, %227, %243 : vector<8x128xi1>, vector<8x128xf32>
    %cst_67 = arith.constant dense<0.000000e+00> : vector<8xf32>
    %245 = vector.multi_reduction <add>, %244, %cst_67 [1] : vector<8x128xf32> to vector<8xf32>
    %246 = vector.shape_cast %245 : vector<8xf32> to vector<8x1xf32>
    %247 = arith.subf %236, %246 : vector<8x1xf32>
    %cst_68 = arith.constant dense<0.000000e+00> : vector<1xf32>
    %248 = vector.multi_reduction <add>, %247, %cst_68 [0] : vector<8x1xf32> to vector<1xf32>
    %249 = vector.shape_cast %248 : vector<1xf32> to vector<1x1xf32>
    %cst_69 = arith.constant 8.000000e+00 : f32
    %250 = vector.broadcast %cst_69 : f32 to vector<1x1xf32>
    %251 = arith.divf %249, %250 : vector<1x1xf32>
    %252 = vector.shape_cast %251 : vector<1x1xf32> to vector<1x1xf32>
    %253 = vector.broadcast %252 : vector<1x1xf32> to vector<1x128xf32>
    %c7 = arith.constant 7 : index
    %c0_70 = arith.constant 0 : index
    %254 = vector.load %arg5[%c7, %c0_70] : memref<8x128xf32, #tpu.memory_space<vmem>>, vector<1x128xf32>
    tpu.vector_store %arg5[%c7, %c0_70], %253 {strides = array<i32>} : memref<8x128xf32, #tpu.memory_space<vmem>>, vector<1x128xf32>,
    return
  }
  func.func @transform_0(%arg0: i32, %arg1: memref<16xi32, #tpu.memory_space<smem>>) -> (i32, i32, i32) {
    %c0_i32 = arith.constant 0 : i32
    %c0_i32_0 = arith.constant 0 : i32
    %c0_i32_1 = arith.constant 0 : i32
    return %arg0, %c0_i32, %c0_i32_0 : i32, i32, i32
  }
  func.func @transform_1(%arg0: i32, %arg1: memref<16xi32, #tpu.memory_space<smem>>) -> (i32, i32, i32) {
    %c0_i32 = arith.constant 0 : i32
    %c0_i32_0 = arith.constant 0 : i32
    %c0_i32_1 = arith.constant 0 : i32
    return %arg0, %c0_i32, %c0_i32_0 : i32, i32, i32
  }
  func.func @transform_2(%arg0: i32, %arg1: memref<16xi32, #tpu.memory_space<smem>>) -> (i32, i32) {
    %c0_i32 = arith.constant 0 : i32
    %c0_i32_0 = arith.constant 0 : i32
    %c0_i32_1 = arith.constant 0 : i32
    return %c0_i32, %c0_i32_0 : i32, i32
  }
  func.func @transform_3(%arg0: i32, %arg1: memref<16xi32, #tpu.memory_space<smem>>) -> (i32, i32) {
    %c0_i32 = arith.constant 0 : i32
    %c0_i32_0 = arith.constant 0 : i32
    return %arg0, %c0_i32 : i32, i32
  }
}

</mosaic_0001>

<bundles_post_ra>
// kernel: tpu_custom_call.1
= control target key start
LH: loop header
LB: loop body
LE: loop exit
PB: predicated region body
PF: predicated region fallthrough
CT: control target
= control target key end

     0   :  { %s1891_s0 = inlined_call_operand.hbm [shape: s32[16], index: 0, kind: input, shape index: {}]   ;;  %s1892_s1 = inlined_call_operand.hbm [shape: f32[2,8,128], index: 1, kind: input, shape index: {}]   ;;  %s1893_s2 = inlined_call_operand.hbm [shape: bf16[2,128,1024], index: 2, kind: input, shape index: {}]   ;;  %s1894_s3 = inlined_call_operand.vmem [shape: bf16[8,128], index: 3, kind: input, shape index: {}]   ;;  %s1895_s4 = inlined_call_operand.hbm [shape: f32[16,128], index: 4, kind: output, shape index: {}]  }
   0x1   :  { %s1309_s17 = scalar_lea.hbm %s1891_s0, 16 }
   0x2   :  { %p1310_p0 = scmp.ne.s32.totalorder %s1891_s0, %s1309_s17  ;;  %p1313_p1 = scmp.lt.u32.totalorder %s1309_s17, %s1891_s0 }
   0x4   :  { %p1315_p2 = pnand %p1313_p1, %p1310_p0 }
   0x6   :  { %1318 = shalt.err (!%p1315_p2)  }
   0x7   :  { %s1453_s22 = smov [#allocation3]  }
   0x8   :  { %10 = dma.hbm_to_smem %s1891_s0, 16, %s1453_s22, [#allocation2] }
   0x9   :  { %1423 = dma.done.wait [#allocation2], 16 }
   0xa   :  { %1424 = vsyncadd [#allocation2], 4294967280 }
   0xb   :  { %12 = sfence }
   0xc   :  { %13 = vsyncpa [#allocation5], 0 }
   0xd   :  { %15 = vsyncpa [#allocation5 + $0x1], 0 }
   0xe   :  { %16 = vsyncpa [#allocation8], 0 }
   0xf   :  { %18 = vsyncpa [#allocation8 + $0x1], 0 }
  0x10   :  { %19 = vsyncpa [#allocation6], 0 }
  0x11   :  { %21 = vsyncpa [#allocation6 + $0x1], 0  ;;  %s1497_s25 = smov 0   ;;  %s1499_s26 = smov 0  }
  0x12   :  { %s1501_s27 = smov 0   ;;  %s1503_s28 = smov 0  }
  0x13 LB: > { %s1518_s0 = sadd.s32 4294967295, %s1451_s28   ;;  %s1140_s29 = sadd.s32 4294967294, %s1451_s28   ;;  %s1451_s28 = sphi %s1503_s28, %s1913_s28   ;;  %s1447_s27 = sphi %s1501_s27, %s1912_s27   ;;  %s1443_s26 = sphi %s1499_s26, %s1911_s26   ;;  %s1439_s25 = sphi %s1497_s25, %s1910_s25  }
  0x14   : > { %s1522_s30 = sadd.s32 1, %s1451_s28   ;;  %s34_s5 = sadd.s32 1, %s1447_s27 }
  0x15   : > { %s31_s6 = ssub.s32 %s1451_s28, %s1522_s30  ;;  %p41_p3 = scmp.ne.s32.totalorder %s1447_s27, %s1443_s26 }
  0x16   : > { %p32_p4 = scmp.eq.s32.totalorder %s31_s6, 0  ;;  %p42_p5 = scmp.eq.s32.totalorder %s1451_s28, 0 }
  0x17   : > { %p47_p6 = scmp.ne.s32.totalorder %s1443_s26, %s1439_s25  ;;  %p48_p7 = scmp.eq.s32.totalorder %s1518_s0, 0 }
  0x18   : > { %s1534_s7 = scalar_select %p32_p4, %s1447_s27, %s34_s5  }
  0x19   : > { %p1536_p8 = por %p42_p5, %p41_p3  ;;  %p1540_p9 = por %p48_p7, %p47_p6 }
  0x1a   : > { %p118_p10 = scmp.eq.s32.totalorder %s1518_s0, 1  ;;  %p124_p11 = scmp.eq.s32.totalorder %s1140_s29, 1 }
  0x1b   : > { %s1899_s9 = scalar_select %p1540_p9, 1, 0 }
  0x1c   : > { %p1239_p13 = scmp.lt.s32.totalorder %s1451_s28, 2  ;;  %p1547_p0 = por %p118_p10, %p41_p3 }
  0x1d   : > { %p1551_p1 = por %p124_p11, %p47_p6  ;;  %s1556_s12 = sand.u32 1, %s1447_s27  }
  0x1e   : > { %s1900_s10 = scalar_select %p1547_p0, 1, 0 }
  0x1f   : > { %s1901_s11 = scalar_select %p1551_p1, 1, 0 }
  0x20   : > { %s1144_s13 = sshll.u32 %s1451_s28, 7  ;;  %s1143_s14 = sshll.u32 %s1556_s12, 3 }
  0x21   : > { %s1563_s17 = scalar_lea.hbm %s1892_s1, %s1144_s13  ;;  %s151_s18 = scalar_lea.vmem [#allocation4], %s1143_s14 }
  0x22   : > { %s158_s19 = sshll.u32 %s151_s18, 4  ;;  %p1567_p2 = pnand %p1239_p13, %p1536_p8  ;;  %s1571_s19 = int_to_ptr.vmem [resolvable:$true] %s158_s19 }
  0x23   : > { %s148_s21 = scalar_lea.sflag [#allocation5], %s1556_s12  ;;  %s1319_s22 = scalar_lea.hbm %s1563_s17, 128 }
  0x24   : > { %p1320_p5 = scmp.ne.s32.totalorder %s1563_s17, %s1319_s22  ;;  %p1321_p6 = pneg %p1567_p2 }
  0x25   : > { %s1324_s29 = scalar_lea.hbm %s1892_s1, 256  ;;  %p1325_p8 = scmp.lt.u32.totalorder %s1563_s17, %s1892_s1 }
  0x26   : > { %p1322_p7 = pnand %p1321_p6, %p1320_p5  ;;  %p1326_p11 = scmp.lt.u32.totalorder %s1324_s29, %s1319_s22 }
  0x27   : > { %p1328_p12 = scmp.lt.u32.totalorder %s1319_s22, %s1563_s17 }
  0x28   : > { %p1323_p10 = pneg %p1322_p7  ;;  %p1327_p13 = por %p1326_p11, %p1325_p8 }
  0x2a   : > { %p1329_p3 = por %p1328_p12, %p1327_p13 }
  0x2c   : > { %p1330_p4 = pnand %p1329_p3, %p1323_p10 }
  0x2e   : > { %1333 = shalt.err (!%p1330_p4)
}
  0x2f   : > { %s1334_s8 = scalar_lea.vmem %s1571_s19, 128  ;;  %s1454_s13 = smov [#allocation4]  }
  0x30   : > { %p1335_p5 = scmp.ne.s32.totalorder %s1571_s19, %s1334_s8  ;;  %s1339_s14 = sshll.u32 %s1454_s13, 4  ;;  %s1340_s14 = int_to_ptr.vmem [resolvable:$false] %s1339_s14 }
  0x31   : > { %s1341_s15 = scalar_lea.vmem %s1340_s14, 256  ;;  %p1342_p0 = scmp.lt.s32.totalorder %s1571_s19, %s1340_s14 }
  0x32   : > { %p1337_p7 = pnand %p1335_p5, %p1321_p6  ;;  %p1343_p8 = scmp.lt.s32.totalorder %s1341_s15, %s1334_s8 }
  0x34   : > { %p1338_p1 = pneg %p1337_p7  ;;  %p1344_p11 = por %p1343_p8, %p1342_p0 }
  0x36   : > { %p1345_p12 = pnand %p1344_p11, %p1338_p1 }
  0x38   : > { %1348 = shalt.err (!%p1345_p12)
}
  0x39   : > { %1231 = dma.hbm_to_vmem [thread:$0]  (!%p1567_p2), %s1563_s17, 128, %s1571_s19, %s148_s21  }
  0x3a   : > { %p1903_p3 = scmp.lt.s32.totalorder %s1451_s28, 3  ;;  %p1904_p4 = scmp.ge.s32.totalorder %s1451_s28, 1 }
  0x3b   : > { %s1145_s18 = sshll.u32 %s1556_s12, 9  ;;  %s1221_s22 = sshll.u32 %s1451_s28, 13 }
  0x3c   : > { %p1605_p10 = pnand %p1904_p4, %p1903_p3  ;;  %s1614_s29 = scalar_lea.hbm %s1893_s2, %s1221_s22 }
  0x3d   : > { %s169_s5 = scalar_lea.vmem [#allocation7], %s1145_s18  ;;  %s166_s17 = scalar_lea.sflag [#allocation8], %s1556_s12 }
  0x3e   : > { %s176_s6 = sshll.u32 %s169_s5, 4  ;;  %s1349_s19 = scalar_lea.hbm %s1614_s29, 8192  ;;  %s1616_s6 = int_to_ptr.vmem [resolvable:$true] %s176_s6 }
  0x3f   : > { %p1350_p0 = scmp.ne.s32.totalorder %s1614_s29, %s1349_s19  ;;  %s1354_s13 = scalar_lea.hbm %s1893_s2, 16384 }
  0x40   : > { %p1355_p5 = scmp.lt.u32.totalorder %s1614_s29, %s1893_s2  ;;  %p1356_p7 = scmp.lt.u32.totalorder %s1354_s13, %s1349_s19 }
  0x41   : > { %p1352_p1 = pnand %p1350_p0, %p1321_p6  ;;  %p1358_p11 = scmp.lt.u32.totalorder %s1349_s19, %s1614_s29 }
  0x42   : > { %p1357_p8 = por %p1356_p7, %p1355_p5 }
  0x43   : > { %p1353_p13 = pneg %p1352_p1 }
  0x44   : > { %p1359_p12 = por %p1358_p11, %p1357_p8 }
  0x46   : > { %p1360_p3 = pnand %p1359_p12, %p1353_p13 }
  0x48   : > { %1363 = shalt.err (!%p1360_p3)
}
  0x49   : > { %s1364_s18 = scalar_lea.vmem %s1616_s6, 8192  ;;  %s1455_s22 = smov [#allocation7]  }
  0x4a   : > { %p1365_p4 = scmp.ne.s32.totalorder %s1616_s6, %s1364_s18  ;;  %s1369_s23 = sshll.u32 %s1455_s22, 4  ;;  %s1370_s23 = int_to_ptr.vmem [resolvable:$false] %s1369_s23 }
  0x4b   : > { %s1371_s24 = scalar_lea.vmem %s1370_s23, 16384  ;;  %p1372_p9 = scmp.lt.s32.totalorder %s1616_s6, %s1370_s23 }
  0x4c   : > { %p1367_p0 = pnand %p1365_p4, %p1321_p6  ;;  %p1373_p5 = scmp.lt.s32.totalorder %s1371_s24, %s1364_s18 }
  0x4e   : > { %p1368_p1 = pneg %p1367_p0  ;;  %p1374_p7 = por %p1373_p5, %p1372_p9 }
  0x50   : > { %p1375_p8 = pnand %p1374_p7, %p1368_p1 }
  0x52   : > { %1378 = shalt.err (!%p1375_p8)
}
  0x53   : > { %s1456_s5 = smov 512   ;;  %s1457_s19 = smov 32  }
  0x54   : > { %1234 = dma.hbm_to_vmem [thread:$0]  (!%p1567_p2), %s1614_s29, 8192, %s1616_s6, %s166_s17, %s1456_s5, %s1456_s5, %s1457_s19  }
  0x55   : > { %188 = sbr.rel (%p1605_p10) target bundleno = 728 (0x2d8), region = 32  ;;  %s1647_s21 = sand.u32 (!%p1605_p10), 1, %s1443_s26  }
  0x56   : > { %s1149_s8 = sshll.u32 (!%p1605_p10), %s1647_s21, 3  ;;  %s191_s13 = scalar_lea.sflag (!%p1605_p10), [#allocation5], %s1647_s21 }
  0x57   : > { %s1653_s14 = scalar_lea.vmem (!%p1605_p10), [#allocation4], %s1149_s8  ;;  %p1906_p9 = scmp.ne.s32.totalorder (!%p1605_p10), %s1899_s9, 0 }
  0x5c   : > { %1426 = dma.done.wait (%p1906_p9), %s191_s13, 128  }
  0x5d   : > { %1428 = vsyncadd (%p1906_p9), %s191_s13, 4294967168  ;;  %s1150_s12 = sshll.u32 %s1647_s21, 9  ;;  %s200_s20 = scalar_lea.sflag [#allocation8], %s1647_s21 }
  0x5e   : > { %s1661_s16 = scalar_lea.vmem [#allocation7], %s1150_s12 }
  0x5f   : > { %1430 = dma.done.wait (%p1906_p9), %s200_s20, 8192  }
  0x60   : > { %1432 = vsyncadd (%p1906_p9), %s200_s20, 4294959104  ;;  %v1458_v0 = vmov 0   ;;  %v233_v1 = vld [vmem:[%s1661_s16] sm:$0xff]  ;;  %v234_v3 = vld [vmem:[%s1661_s16 + $0x8] sm:$0xff]  ;;  %s1797_s6 = sshll.u32 %s1518_s0, 3  ;;  %p1907_p6 = scmp.ne.s32.totalorder %s1900_s10, 0 }
  0x61   : > { %650 = vmatprep.mubr.bf16.mxu0 %v1458_v0  ;;  %691 = vmatprep.mubr.bf16.mxu1 %v1458_v0  ;;  %v237_v2 = vld [vmem:[%s1661_s16 + $0x20] sm:$0xff]  ;;  %v238_v5 = vld [vmem:[%s1661_s16 + $0x28] sm:$0xff]  ;;  %v235_v63 = vld [vmem:[%s1661_s16 + $0x10] sm:$0xff]  ;;  %s831_s17 = sadd.s32 1, %s1797_s6  ;;  %s800_s15 = sld [smem:[#allocation3 + %s1797_s6]] }
  0x62   : > { %v1153_v4 = vcombine.high %v233_v1, %v237_v2  ;;  %v1152_v6 = vcombine.low %v233_v1, %v237_v2  ;;  %v241_v7 = vld [vmem:[%s1661_s16 + $0x40] sm:$0xff]  ;;  %v1155_v9 = vcombine.high %v234_v3, %v238_v5  ;;  %v1154_v10 = vcombine.low %v234_v3, %v238_v5  ;;  %v242_v12 = vld [vmem:[%s1661_s16 + $0x48] sm:$0xff]  ;;  %v239_v1 = vld [vmem:[%s1661_s16 + $0x30] sm:$0xff]  ;;  %s832_s18 = sld [smem:[#allocation3 + %s831_s17]]  ;;  %s862_s22 = sadd.s32 2, %s1797_s6 }
  0x63   : > { %v245_v8 = vld [vmem:[%s1661_s16 + $0x60] sm:$0xff]  ;;  %v246_v13 = vld [vmem:[%s1661_s16 + $0x68] sm:$0xff]  ;;  %v236_v2 = vld [vmem:[%s1661_s16 + $0x18] sm:$0xff]  ;;  %s893_s23 = sadd.s32 3, %s1797_s6  ;;  %s863_s24 = sld [smem:[#allocation3 + %s862_s22]] }
  0x64   : > { %v1161_v11 = vcombine.high %v241_v7, %v245_v8  ;;  %v249_v14 = vld [vmem:[%s1661_s16 + $0x80] sm:$0xff]  ;;  %618 = vmatprep.subr.bf16.mxu0 %v1153_v4  ;;  %v1163_v15 = vcombine.high %v242_v12, %v246_v13  ;;  %v250_v17 = vld [vmem:[%s1661_s16 + $0x88] sm:$0xff]  ;;  %659 = vmatprep.subr.bf16.mxu1 %v1155_v9  ;;  %v1160_v19 = vcombine.low %v241_v7, %v245_v8  ;;  %v240_v3 = vld [vmem:[%s1661_s16 + $0x38] sm:$0xff]  ;;  %s894_s5 = sld [smem:[#allocation3 + %s893_s23]]  ;;  %s924_s19 = sadd.s32 4, %s1797_s6 }
  0x65   : > { %v253_v16 = vld [vmem:[%s1661_s16 + $0xa0] sm:$0xff]  ;;  %v254_v18 = vld [vmem:[%s1661_s16 + $0xa8] sm:$0xff]  ;;  %619 = vmatpush1.bf16.msra.mxu0 %v1152_v6  ;;  %660 = vmatpush1.bf16.msra.mxu1 %v1154_v10  ;;  %v1162_v20 = vcombine.low %v242_v12, %v246_v13  ;;  %v1157_v6 = vcombine.high %v235_v63, %v239_v1  ;;  %v1159_v7 = vcombine.high %v236_v2, %v240_v3  ;;  %v243_v8 = vld [vmem:[%s1661_s16 + $0x50] sm:$0xff]  ;;  %s955_s13 = sadd.s32 5, %s1797_s6  ;;  %s986_s20 = sadd.s32 6, %s1797_s6 }
  0x66   : > { %620 = vmatprep.subr.bf16.mxu0 %v1161_v11  ;;  %v1169_v21 = vcombine.high %v249_v14, %v253_v16  ;;  %661 = vmatprep.subr.bf16.mxu1 %v1163_v15  ;;  %v1171_v22 = vcombine.high %v250_v17, %v254_v18  ;;  %v257_v23 = vld [vmem:[%s1661_s16 + $0xc0] sm:$0xff]  ;;  %v258_v25 = vld [vmem:[%s1661_s16 + $0xc8] sm:$0xff]  ;;  %v1168_v27 = vcombine.low %v249_v14, %v253_v16  ;;  %v247_v9 = vld [vmem:[%s1661_s16 + $0x70] sm:$0xff]  ;;  %s956_s12 = sld [smem:[#allocation3 + %s955_s13]]  ;;  %s1034_s23 = scalar_lea.sflag [#allocation6], %s1647_s21 }
  0x67   : > { %v261_v24 = vld [vmem:[%s1661_s16 + $0xe0] sm:$0xff]  ;;  %v262_v26 = vld [vmem:[%s1661_s16 + $0xe8] sm:$0xff]  ;;  %v1170_v28 = vcombine.low %v250_v17, %v254_v18  ;;  %v244_v10 = vld [vmem:[%s1661_s16 + $0x58] sm:$0xff]  ;;  %v1156_v13 = vcombine.low %v235_v63, %v239_v1  ;;  %v1158_v14 = vcombine.low %v236_v2, %v240_v3  ;;  %v1165_v15 = vcombine.high %v243_v8, %v247_v9  ;;  %s987_s9 = sld [smem:[#allocation3 + %s986_s20]] }
  0x68   : > { %v1177_v29 = vcombine.high %v257_v23, %v261_v24  ;;  %v1179_v30 = vcombine.high %v258_v25, %v262_v26  ;;  %v265_v31 = vld [vmem:[%s1661_s16 + $0x100] sm:$0xff]  ;;  %v266_v33 = vld [vmem:[%s1661_s16 + $0x108] sm:$0xff]  ;;  %v1176_v35 = vcombine.low %v257_v23, %v261_v24  ;;  %v1178_v36 = vcombine.low %v258_v25, %v262_v26  ;;  %v248_v11 = vld [vmem:[%s1661_s16 + $0x78] sm:$0xff] }
  0x69   : > { %621 = vmatpush1.bf16.msra.mxu0 %v1160_v19  ;;  %662 = vmatpush1.bf16.msra.mxu1 %v1162_v20  ;;  %v269_v32 = vld [vmem:[%s1661_s16 + $0x120] sm:$0xff]  ;;  %v270_v34 = vld [vmem:[%s1661_s16 + $0x128] sm:$0xff]  ;;  %v1167_v16 = vcombine.high %v244_v10, %v248_v11  ;;  %v251_v17 = vld [vmem:[%s1661_s16 + $0x90] sm:$0xff]  ;;  %v782_v3 = vlaneseq }
  0x6a   : > { %622 = vmatprep.subr.bf16.mxu0 %v1169_v21  ;;  %663 = vmatprep.subr.bf16.mxu1 %v1171_v22  ;;  %v1185_v37 = vcombine.high %v265_v31, %v269_v32  ;;  %v1187_v38 = vcombine.high %v266_v33, %v270_v34  ;;  %v273_v39 = vld [vmem:[%s1661_s16 + $0x140] sm:$0xff]  ;;  %v274_v41 = vld [vmem:[%s1661_s16 + $0x148] sm:$0xff]  ;;  %v1184_v43 = vcombine.low %v265_v31, %v269_v32  ;;  %v255_v18 = vld [vmem:[%s1661_s16 + $0xb0] sm:$0xff] }
  0x6b   : > { %v277_v40 = vld [vmem:[%s1661_s16 + $0x160] sm:$0xff]  ;;  %v278_v42 = vld [vmem:[%s1661_s16 + $0x168] sm:$0xff]  ;;  %v1186_v44 = vcombine.low %v266_v33, %v270_v34  ;;  %v252_v19 = vld [vmem:[%s1661_s16 + $0x98] sm:$0xff]  ;;  %v1164_v21 = vcombine.low %v243_v8, %v247_v9  ;;  %v1166_v22 = vcombine.low %v244_v10, %v248_v11  ;;  %v1173_v23 = vcombine.high %v251_v17, %v255_v18 }
  0x6c   : > { %v1193_v45 = vcombine.high %v273_v39, %v277_v40  ;;  %v1195_v46 = vcombine.high %v274_v41, %v278_v42  ;;  %v281_v47 = vld [vmem:[%s1661_s16 + $0x180] sm:$0xff]  ;;  %v282_v49 = vld [vmem:[%s1661_s16 + $0x188] sm:$0xff]  ;;  %v1192_v51 = vcombine.low %v273_v39, %v277_v40  ;;  %v1194_v52 = vcombine.low %v274_v41, %v278_v42  ;;  %v256_v20 = vld [vmem:[%s1661_s16 + $0xb8] sm:$0xff] }
  0x6d   : > { %623 = vmatpush1.bf16.msra.mxu0 %v1168_v27  ;;  %664 = vmatpush1.bf16.msra.mxu1 %v1170_v28  ;;  %v285_v48 = vld [vmem:[%s1661_s16 + $0x1a0] sm:$0xff]  ;;  %v286_v50 = vld [vmem:[%s1661_s16 + $0x1a8] sm:$0xff]  ;;  %v1175_v24 = vcombine.high %v252_v19, %v256_v20  ;;  %v259_v25 = vld [vmem:[%s1661_s16 + $0xd0] sm:$0xff] }
  0x6e   : > { %624 = vmatprep.subr.bf16.mxu0 %v1177_v29  ;;  %665 = vmatprep.subr.bf16.mxu1 %v1179_v30  ;;  %v1201_v53 = vcombine.high %v281_v47, %v285_v48  ;;  %v1203_v54 = vcombine.high %v282_v49, %v286_v50  ;;  %v289_v55 = vld [vmem:[%s1661_s16 + $0x1c0] sm:$0xff]  ;;  %v290_v57 = vld [vmem:[%s1661_s16 + $0x1c8] sm:$0xff]  ;;  %v1200_v59 = vcombine.low %v281_v47, %v285_v48  ;;  %v263_v26 = vld [vmem:[%s1661_s16 + $0xf0] sm:$0xff] }
  0x6f   : > { %v293_v56 = vld [vmem:[%s1661_s16 + $0x1e0] sm:$0xff]  ;;  %v294_v58 = vld [vmem:[%s1661_s16 + $0x1e8] sm:$0xff]  ;;  %v1202_v60 = vcombine.low %v282_v49, %v286_v50  ;;  %v260_v27 = vld [vmem:[%s1661_s16 + $0xd8] sm:$0xff]  ;;  %v1172_v29 = vcombine.low %v251_v17, %v255_v18  ;;  %v1174_v30 = vcombine.low %v252_v19, %v256_v20  ;;  %v1181_v31 = vcombine.high %v259_v25, %v263_v26 }
  0x70   : > { %v1209_v61 = vcombine.high %v289_v55, %v293_v56  ;;  %v1211_v62 = vcombine.high %v290_v57, %v294_v58  ;;  %v1208_v4 = vcombine.low %v289_v55, %v293_v56  ;;  %v1210_v5 = vcombine.low %v290_v57, %v294_v58  ;;  %v1712_v12 = vld [vmem:[%s1894_s3] sm:$0xf]  ;;  %v264_v28 = vld [vmem:[%s1661_s16 + $0xf8] sm:$0xff]  ;;  %v267_v33 = vld [vmem:[%s1661_s16 + $0x110] sm:$0xff] }
  0x71   : > { %625 = vmatpush1.bf16.msra.mxu0 %v1176_v35  ;;  %666 = vmatpush1.bf16.msra.mxu1 %v1178_v36  ;;  %v1183_v32 = vcombine.high %v260_v27, %v264_v28  ;;  %v271_v34 = vld [vmem:[%s1661_s16 + $0x130] sm:$0xff]  ;;  %v268_v35 = vld [vmem:[%s1661_s16 + $0x118] sm:$0xff] }
  0x72   : > { %626 = vmatprep.subr.bf16.mxu0 %v1185_v37  ;;  %667 = vmatprep.subr.bf16.mxu1 %v1187_v38  ;;  %v272_v36 = vld [vmem:[%s1661_s16 + $0x138] sm:$0xff]  ;;  %v1180_v37 = vcombine.low %v259_v25, %v263_v26  ;;  %v1189_v38 = vcombine.high %v267_v33, %v271_v34  ;;  %v275_v40 = vld [vmem:[%s1661_s16 + $0x150] sm:$0xff] }
  0x73   : > { %v1191_v39 = vcombine.high %v268_v35, %v272_v36  ;;  %v279_v41 = vld [vmem:[%s1661_s16 + $0x170] sm:$0xff]  ;;  %v276_v42 = vld [vmem:[%s1661_s16 + $0x158] sm:$0xff] }
  0x74   : > { %v283_v48 = vld [vmem:[%s1661_s16 + $0x190] sm:$0xff]  ;;  %v284_v50 = vld [vmem:[%s1661_s16 + $0x198] sm:$0xff] }
  0x75   : > { %627 = vmatpush1.bf16.msra.mxu0 %v1184_v43  ;;  %668 = vmatpush1.bf16.msra.mxu1 %v1186_v44  ;;  %v280_v43 = vld [vmem:[%s1661_s16 + $0x178] sm:$0xff]  ;;  %v1188_v44 = vcombine.low %v267_v33, %v271_v34  ;;  %v287_v49 = vld [vmem:[%s1661_s16 + $0x1b0] sm:$0xff] }
  0x76   : > { %628 = vmatprep.subr.bf16.mxu0 %v1193_v45  ;;  %669 = vmatprep.subr.bf16.mxu1 %v1195_v46  ;;  %v1190_v45 = vcombine.low %v268_v35, %v272_v36  ;;  %v1197_v46 = vcombine.high %v275_v40, %v279_v41  ;;  %v1199_v47 = vcombine.high %v276_v42, %v280_v43  ;;  %v291_v56 = vld [vmem:[%s1661_s16 + $0x1d0] sm:$0xff]  ;;  %v292_v58 = vld [vmem:[%s1661_s16 + $0x1d8] sm:$0xff] }
  0x77   : > { %v295_v57 = vld [vmem:[%s1661_s16 + $0x1f0] sm:$0xff] }
  0x78   : > { %v1212_v1 = vcombine.low %v291_v56, %v295_v57 }
  0x79   : > { %629 = vmatpush1.bf16.msra.mxu0 %v1192_v51  ;;  %670 = vmatpush1.bf16.msra.mxu1 %v1194_v52  ;;  %v288_v51 = vld [vmem:[%s1661_s16 + $0x1b8] sm:$0xff]  ;;  %v1196_v52 = vcombine.low %v275_v40, %v279_v41 }
  0x7a   : > { %630 = vmatprep.subr.bf16.mxu0 %v1201_v53  ;;  %671 = vmatprep.subr.bf16.mxu1 %v1203_v54  ;;  %v1198_v53 = vcombine.low %v276_v42, %v280_v43  ;;  %v1205_v54 = vcombine.high %v283_v48, %v287_v49  ;;  %v1207_v55 = vcombine.high %v284_v50, %v288_v51 }
  0x7d   : > { %631 = vmatpush1.bf16.msra.mxu0 %v1200_v59  ;;  %672 = vmatpush1.bf16.msra.mxu1 %v1202_v60  ;;  %v296_v59 = vld [vmem:[%s1661_s16 + $0x1f8] sm:$0xff]  ;;  %v1204_v60 = vcombine.low %v283_v48, %v287_v49  ;;  %s1017_s16 = sadd.s32 7, %s1797_s6  ;;  %s1832_s6 = scalar_lea.vmem [#allocation9], %s1149_s8 }
  0x7e   : > { %632 = vmatprep.subr.bf16.mxu0 %v1209_v61  ;;  %673 = vmatprep.subr.bf16.mxu1 %v1211_v62  ;;  %v1206_v61 = vcombine.low %v284_v50, %v288_v51  ;;  %v1213_v62 = vcombine.high %v291_v56, %v295_v57  ;;  %v1215_v63 = vcombine.high %v292_v58, %v296_v59  ;;  %s1018_s29 = sld [smem:[#allocation3 + %s1017_s16]]  ;;  %s1218_s8 = sshll.u32 %s1518_s0, 7 }
  0x7f   : > { %v1214_v2 = vcombine.low %v292_v58, %v296_v59  ;;  %s1047_s17 = sshll.u32 %s1832_s6, 4  ;;  %s1845_s22 = scalar_lea.hbm %s1895_s4, %s1218_s8  ;;  %s1847_s17 = int_to_ptr.vmem [resolvable:$true] %s1047_s17 }
  0x80   : > { %s1459_s0 = smov [#allocation9]  }
  0x81   : > { %633 = vmatpush1.bf16.msra.mxu0 %v1208_v4  ;;  %674 = vmatpush1.bf16.msra.mxu1 %v1210_v5  ;;  %v785_v4 = vshrl.u32 %v782_v3, 7 }
  0x82   : > { %700 = vmatprep.subr.bf16.mxu0 %v1157_v6  ;;  %741 = vmatprep.subr.bf16.mxu1 %v1159_v7  ;;  %v297_v6 = vld [vmem:[%s1653_s14] sm:$0xff]  ;;  %s925_s14 = sld [smem:[#allocation3 + %s924_s19]] }
  0x83   : > { %v786_v5 = vsub.s32 0, %v785_v4  ;;  %v849_v7 = vsub.s32 2, %v785_v4  ;;  %v880_v8 = vsub.s32 3, %v785_v4  ;;  %v818_v10 = vsub.s32 1, %v785_v4 }
  0x84   : > { %651 = vmatmul.mubr.bf16.vlgmr.msra.gmra.mrb[0].mxu0 %v1712_v12  ;;  %692 = vmatmul.mubr.bf16.vlgmr.msra.gmra.mrb[0].mxu1 %v1712_v12  ;;  %v911_v26 = vsub.s32 4, %v785_v4 }
  0x85   : > { %701 = vmatpush1.bf16.msra.mxu0 %v1156_v13  ;;  %742 = vmatpush1.bf16.msra.mxu1 %v1158_v14  ;;  %v787_v9 = vrot.slane %v297_v6, %v786_v5  ;;  %v850_v11 = vrot.slane %v297_v6, %v849_v7  ;;  %v881_v14 = vrot.slane %v297_v6, %v880_v8 }
  0x86   : > { %702 = vmatprep.subr.bf16.mxu0 %v1165_v15  ;;  %743 = vmatprep.subr.bf16.mxu1 %v1167_v16  ;;  %v819_v18 = vrot.slane %v297_v6, %v818_v10 }
  0x87   : > { %732 = vmatprep.mubr.bf16.mxu0 %v1458_v0  ;;  %773 = vmatprep.mubr.bf16.mxu1 %v1458_v0  ;;  %v1182_v0 = vcombine.low %v260_v27, %v264_v28  ;;  %v942_v27 = vsub.s32 5, %v785_v4  ;;  %v973_v28 = vsub.s32 6, %v785_v4 }
  0x89   : > { %703 = vmatpush1.bf16.msra.mxu0 %v1164_v21  ;;  %744 = vmatpush1.bf16.msra.mxu1 %v1166_v22 }
  0x8a   : > { %704 = vmatprep.subr.bf16.mxu0 %v1173_v23  ;;  %745 = vmatprep.subr.bf16.mxu1 %v1175_v24 }
  0x8d   : > { %705 = vmatpush1.bf16.msra.mxu0 %v1172_v29  ;;  %746 = vmatpush1.bf16.msra.mxu1 %v1174_v30  ;;  %v1004_v29 = vsub.s32 7, %v785_v4  ;;  %v912_v30 = vrot.slane %v297_v6, %v911_v26  ;;  %v957_v26 = vstv %s956_s12 }
  0x8e   : > { %706 = vmatprep.subr.bf16.mxu0 %v1181_v31  ;;  %747 = vmatprep.subr.bf16.mxu1 %v1183_v32  ;;  %v943_v31 = vrot.slane %v297_v6, %v942_v27  ;;  %v974_v32 = vrot.slane %v297_v6, %v973_v28 }
  0x8f   : > { %v1005_v34 = vrot.slane %v297_v6, %v1004_v29  ;;  %v988_v29 = vstv %s987_s9 }
  0x91   : > { %707 = vmatpush1.bf16.msra.mxu0 %v1180_v37  ;;  %748 = vmatpush1.bf16.msra.mxu1 %v1182_v0 }
  0x92   : > { %708 = vmatprep.subr.bf16.mxu0 %v1189_v38  ;;  %749 = vmatprep.subr.bf16.mxu1 %v1191_v39 }
  0x95   : > { %709 = vmatpush1.bf16.msra.mxu0 %v1188_v44  ;;  %750 = vmatpush1.bf16.msra.mxu1 %v1190_v45 }
  0x96   : > { %710 = vmatprep.subr.bf16.mxu0 %v1197_v46  ;;  %751 = vmatprep.subr.bf16.mxu1 %v1199_v47 }
  0x99   : > { %711 = vmatpush1.bf16.msra.mxu0 %v1196_v52  ;;  %752 = vmatpush1.bf16.msra.mxu1 %v1198_v53 }
  0x9a   : > { %712 = vmatprep.subr.bf16.mxu0 %v1205_v54  ;;  %753 = vmatprep.subr.bf16.mxu1 %v1207_v55 }
  0x9d   : > { %713 = vmatpush1.bf16.msra.mxu0 %v1204_v60  ;;  %754 = vmatpush1.bf16.msra.mxu1 %v1206_v61 }
  0x9e   : > { %714 = vmatprep.subr.bf16.mxu0 %v1213_v62  ;;  %755 = vmatprep.subr.bf16.mxu1 %v1215_v63 }
  0xa1   : > { %715 = vmatpush1.bf16.msra.mxu0 %v1212_v1  ;;  %756 = vmatpush1.bf16.msra.mxu1 %v1214_v2 }
  0xa4   : > { %733 = vmatmul.mubr.bf16.vlgmr.msra.gmra.mrb[4].mxu0 %v1712_v12  ;;  %774 = vmatmul.mubr.bf16.vlgmr.msra.gmra.mrb[4].mxu1 %v1712_v12 }
 0x157   : > { %v652_v13 = vpop.f32.mrb[0].mxu0  ;;  %v693_v16 = vpop.f32.mrb[0].mxu1 }
 0x158   : > { %v1746_v15 = vadd.f32 %v787_v9, %v652_v13  ;;  %v654_v17 = vpop.f32.mrb[1].mxu0  ;;  %v1748_v19 = vadd.f32 %v850_v11, %v693_v16  ;;  %v695_v20 = vpop.f32.mrb[1].mxu1  ;;  %v801_v16 = vstv %s800_s15 }
 0x159   : > { %v656_v12 = vpop.f32.mrb[2].mxu0  ;;  %v697_v22 = vpop.f32.mrb[2].mxu1  ;;  %v1752_v23 = vadd.f32 %v881_v14, %v695_v20  ;;  %v1754_v25 = vadd.f32 %v819_v18, %v654_v17  ;;  %v783_v14 = vand.u32 127, %v782_v3  ;;  %v833_v17 = vstv %s832_s18 }
 0x15a   : > { %789 = vmax.xlane.f32.xlu0 %v1746_v15  ;;  %v657_v21 = vpop.f32.mrb[3].mxu0  ;;  %852 = vmax.xlane.f32.xlu1 %v1748_v19  ;;  %v698_v24 = vpop.f32.mrb[3].mxu1  ;;  %v864_v20 = vstv %s863_s24  ;;  %s1379_s24 = scalar_lea.vmem %s1847_s17, 128 }
 0x15b   : > { %vm802_vm0 = vcmp.eq.s32.totalorder %v783_v14, %v801_v16  ;;  %vm834_vm1 = vcmp.eq.s32.totalorder %v783_v14, %v833_v17  ;;  %v895_v21 = vstv %s894_s5  ;;  %vm865_vm2 = vcmp.eq.s32.totalorder %v783_v14, %v864_v20  ;;  %p1380_p2 = scmp.ne.s32.totalorder %s1847_s17, %s1379_s24  ;;  %s1383_s5 = sshll.u32 %s1459_s0, 4  ;;  %s1384_s5 = int_to_ptr.vmem [resolvable:$false] %s1383_s5 }
 0x15c   : > { %v803_v22 = vsel %vm802_vm0, %v1746_v15, 0.0  ;;  %v835_v3 = vsel %vm834_vm1, %v1754_v25, 0.0  ;;  %vm896_vm3 = vcmp.eq.s32.totalorder %v783_v14, %v895_v21  ;;  %v926_v24 = vstv %s925_s14  ;;  %s1385_s19 = scalar_lea.vmem %s1384_s5, 256  ;;  %p1386_p11 = scmp.lt.s32.totalorder %s1847_s17, %s1384_s5 }
 0x15d   : > { %v866_v27 = vsel %vm865_vm2, %v1748_v19, 0.0  ;;  %v897_v28 = vsel %vm896_vm3, %v1752_v23, 0.0  ;;  %vm927_vm4 = vcmp.eq.s32.totalorder %v783_v14, %v926_v24  ;;  %vm958_vm5 = vcmp.eq.s32.totalorder %v783_v14, %v957_v26  ;;  %p1381_p10 = pnand %p1380_p2, %p1907_p6  ;;  %p1387_p12 = scmp.lt.s32.totalorder %s1385_s19, %s1379_s24 }
 0x15e   : > { %821 = vmax.xlane.f32.xlu0 %v1754_v25  ;;  %883 = vmax.xlane.f32.xlu1 %v1752_v23  ;;  %vm989_vm6 = vcmp.eq.s32.totalorder %v783_v14, %v988_v29 }
 0x15f   : > { %p1382_p13 = pneg %p1381_p10  ;;  %p1388_p3 = por %p1387_p12, %p1386_p11 }
 0x161   : > { %p1389_p4 = pnand %p1388_p3, %p1382_p13 }
 0x177   : > { %v734_v33 = vpop.f32.mrb[4].mxu0  ;;  %v775_v37 = vpop.f32.mrb[4].mxu1 }
 0x178   : > { %v1758_v35 = vadd.f32 %v912_v30, %v734_v33  ;;  %v736_v36 = vpop.f32.mrb[5].mxu0  ;;  %v777_v39 = vpop.f32.mrb[5].mxu1  ;;  %v1762_v40 = vadd.f32 %v974_v32, %v775_v37  ;;  %v1019_v30 = vstv %s1018_s29 }
 0x179   : > { %v1760_v0 = vadd.f32 %v943_v31, %v736_v36  ;;  %v738_v38 = vpop.f32.mrb[6].mxu0  ;;  %v779_v41 = vpop.f32.mrb[6].mxu1  ;;  %v1765_v43 = vadd.f32 %v1005_v34, %v777_v39  ;;  %vm1020_vm7 = vcmp.eq.s32.totalorder %v783_v14, %v1019_v30 }
 0x17a   : > { %914 = vmax.xlane.f32.xlu0 %v1758_v35  ;;  %v739_v42 = vpop.f32.mrb[7].mxu0  ;;  %v780_v44 = vpop.f32.mrb[7].mxu1  ;;  %v990_v31 = vsel %vm989_vm6, %v1762_v40, 0.0 }
 0x17b   : > { %945 = vmax.xlane.f32.xlu1 %v1760_v0 }
 0x17e   : > { %976 = vmax.xlane.f32.xlu0 %v1762_v40 }
 0x17f   : > { %1007 = vmax.xlane.f32.xlu1 %v1765_v43 }
 0x1e7   : > { %v1770_v45 = vpop.xlane.xlu0 %789  ;;  %v1772_v46 = vpop.xlane.xlu1 %852 }
 0x1e8   : > { %v791_v47 = vsub.f32 %v1746_v15, %v1770_v45  ;;  %v854_v48 = vsub.f32 %v1748_v19, %v1772_v46  ;;  %v928_v15 = vsel %vm927_vm4, %v1758_v35, 0.0  ;;  %v1021_v19 = vsel %vm1020_vm7, %v1765_v43, 0.0 }
 0x1ea   : > { %v792_v49 = vmul.f32 1.442695, %v791_v47  ;;  %v855_v50 = vmul.f32 1.442695, %v854_v48 }
 0x1eb   : > { %v1778_v51 = vpop.xlane.xlu0 %821  ;;  %v1780_v52 = vpop.xlane.xlu1 %883 }
 0x1ec   : > { %1277 = vpow2.f32 %v792_v49  ;;  %v823_v53 = vsub.f32 %v1754_v25, %v1778_v51  ;;  %v885_v54 = vsub.f32 %v1752_v23, %v1780_v52  ;;  %v959_v25 = vsel %vm958_vm5, %v1760_v0, 0.0 }
 0x1ed   : > { %1279 = vpow2.f32 %v855_v50 }
 0x1ee   : > { %v824_v55 = vmul.f32 1.442695, %v823_v53  ;;  %v886_v56 = vmul.f32 1.442695, %v885_v54 }
 0x1f0   : > { %1281 = vpow2.f32 %v824_v55 }
 0x1f1   : > { %1283 = vpow2.f32 %v886_v56 }
 0x1f6   : > { %v1278_v57 = vpop.eup %1277 }
 0x1f7   : > { %794 = vadd.xlane.f32.xlu0 %v1278_v57  ;;  %v1280_v58 = vpop.eup %1279 }
 0x1fa   : > { %v1282_v59 = vpop.eup %1281 }
 0x1fb   : > { %857 = vadd.xlane.f32.xlu0 %v1280_v58  ;;  %826 = vadd.xlane.f32.xlu1 %v1282_v59  ;;  %v1284_v60 = vpop.eup %1283 }
 0x1ff   : > { %888 = vadd.xlane.f32.xlu1 %v1284_v60 }
 0x207   : > { %v1786_v61 = vpop.xlane.xlu0 %914 }
 0x208   : > { %v916_v62 = vsub.f32 %v1758_v35, %v1786_v61  ;;  %v1790_v63 = vpop.xlane.xlu1 %945 }
 0x209   : > { %v947_v1 = vsub.f32 %v1760_v0, %v1790_v63 }
 0x20a   : > { %v917_v2 = vmul.f32 1.442695, %v916_v62 }
 0x20b   : > { %v948_v4 = vmul.f32 1.442695, %v947_v1  ;;  %v1794_v5 = vpop.xlane.xlu0 %976 }
 0x20c   : > { %1285 = vpow2.f32 %v917_v2  ;;  %v978_v6 = vsub.f32 %v1762_v40, %v1794_v5  ;;  %v1801_v7 = vpop.xlane.xlu1 %1007 }
 0x20d   : > { %1287 = vpow2.f32 %v948_v4  ;;  %v1009_v8 = vsub.f32 %v1765_v43, %v1801_v7 }
 0x20e   : > { %v979_v9 = vmul.f32 1.442695, %v978_v6 }
 0x20f   : > { %v1010_v10 = vmul.f32 1.442695, %v1009_v8 }
 0x210   : > { %1289 = vpow2.f32 %v979_v9 }
 0x211   : > { %1291 = vpow2.f32 %v1010_v10 }
 0x216   : > { %v1286_v11 = vpop.eup %1285 }
 0x217   : > { %v1288_v13 = vpop.eup %1287  ;;  %919 = vadd.xlane.f32.xlu0 %v1286_v11 }
 0x218   : > { %950 = vadd.xlane.f32.xlu1 %v1288_v13 }
 0x21a   : > { %v1290_v18 = vpop.eup %1289 }
 0x21b   : > { %v1292_v12 = vpop.eup %1291  ;;  %981 = vadd.xlane.f32.xlu0 %v1290_v18 }
 0x21c   : > { %1012 = vadd.xlane.f32.xlu1 %v1292_v12 }
 0x21f   : > { %804 = vadd.xlane.f32.xlu0 %v803_v22 }
 0x220   : > { %836 = vadd.xlane.f32.xlu1 %v835_v3 }
 0x223   : > { %867 = vadd.xlane.f32.xlu0 %v866_v27 }
 0x224   : > { %898 = vadd.xlane.f32.xlu1 %v897_v28 }
 0x227   : > { %929 = vadd.xlane.f32.xlu0 %v928_v15 }
 0x228   : > { %960 = vadd.xlane.f32.xlu1 %v959_v25 }
 0x22b   : > { %991 = vadd.xlane.f32.xlu0 %v990_v31 }
 0x22c   : > { %1022 = vadd.xlane.f32.xlu1 %v1021_v19 }
 0x284   : > { %v795_v23 = vpop.xlane.xlu0 %794 }
 0x285   : > { %1293 = vlog2.f32 %v795_v23 }
 0x288   : > { %v827_v32 = vpop.xlane.xlu1 %826  ;;  %v858_v33 = vpop.xlane.xlu0 %857 }
 0x289   : > { %1295 = vlog2.f32 %v827_v32 }
 0x28a   : > { %1297 = vlog2.f32 %v858_v33 }
 0x28c   : > { %v889_v34 = vpop.xlane.xlu1 %888 }
 0x28d   : > { %1299 = vlog2.f32 %v889_v34 }
 0x28f   : > { %v1294_v35 = vpop.eup %1293 }
 0x290   : > { %v797_v38 = vmul.f32 0.6931472, %v1294_v35 }
 0x292   : > { %v798_v47 = vadd.f32 %v797_v38, %v1770_v45 }
 0x293   : > { %v1296_v37 = vpop.eup %1295 }
 0x294   : > { %v1298_v39 = vpop.eup %1297  ;;  %v829_v40 = vmul.f32 0.6931472, %v1296_v37 }
 0x295   : > { %v860_v44 = vmul.f32 0.6931472, %v1298_v39 }
 0x296   : > { %v830_v50 = vadd.f32 %v829_v40, %v1778_v51 }
 0x297   : > { %v1300_v42 = vpop.eup %1299  ;;  %v861_v58 = vadd.f32 %v860_v44, %v1772_v46 }
 0x298   : > { %v891_v48 = vmul.f32 0.6931472, %v1300_v42 }
 0x29a   : > { %v892_v2 = vadd.f32 %v891_v48, %v1780_v52 }
 0x2a4   : > { %v920_v36 = vpop.xlane.xlu0 %919 }
 0x2a5   : > { %1301 = vlog2.f32 %v920_v36  ;;  %v951_v0 = vpop.xlane.xlu1 %950 }
 0x2a6   : > { %1303 = vlog2.f32 %v951_v0 }
 0x2a8   : > { %v982_v41 = vpop.xlane.xlu0 %981 }
 0x2a9   : > { %1305 = vlog2.f32 %v982_v41  ;;  %v1013_v43 = vpop.xlane.xlu1 %1012 }
 0x2aa   : > { %1307 = vlog2.f32 %v1013_v43 }
 0x2ac   : > { %v805_v49 = vpop.xlane.xlu0 %804 }
 0x2ad   : > { %v806_v53 = vsub.f32 %v798_v47, %v805_v49  ;;  %v837_v54 = vpop.xlane.xlu1 %836 }
 0x2ae   : > { %v838_v55 = vsub.f32 %v830_v50, %v837_v54 }
 0x2af   : > { %v1302_v56 = vpop.eup %1301  ;;  %v807_v57 = vrot.slane %v806_v53, 4 }
 0x2b0   : > { %v1304_v59 = vpop.eup %1303  ;;  %v922_v60 = vmul.f32 0.6931472, %v1302_v56  ;;  %v839_v62 = vrot.slane %v838_v55, 4  ;;  %v868_v1 = vpop.xlane.xlu0 %867 }
 0x2b1   : > { %v953_v4 = vmul.f32 0.6931472, %v1304_v59  ;;  %v808_v6 = vadd.f32 %v807_v57, %v806_v53  ;;  %v869_v45 = vsub.f32 %v861_v58, %v868_v1  ;;  %v899_v8 = vpop.xlane.xlu1 %898 }
 0x2b2   : > { %v840_v9 = vadd.f32 %v839_v62, %v838_v55  ;;  %v900_v10 = vsub.f32 %v892_v2, %v899_v8  ;;  %v923_v51 = vadd.f32 %v922_v60, %v1786_v61 }
 0x2b3   : > { %v1306_v11 = vpop.eup %1305  ;;  %v809_v13 = vrot.slane %v808_v6, 2  ;;  %v870_v14 = vrot.slane %v869_v45, 4  ;;  %v954_v16 = vadd.f32 %v953_v4, %v1790_v63 }
 0x2b4   : > { %v1308_v46 = vpop.eup %1307  ;;  %v984_v17 = vmul.f32 0.6931472, %v1306_v11  ;;  %v841_v18 = vrot.slane %v840_v9, 2  ;;  %v901_v12 = vrot.slane %v900_v10, 4  ;;  %v930_v20 = vpop.xlane.xlu0 %929 }
 0x2b5   : > { %v1015_v21 = vmul.f32 0.6931472, %v1308_v46  ;;  %v810_v52 = vadd.f32 %v809_v13, %v808_v6  ;;  %v871_v22 = vadd.f32 %v870_v14, %v869_v45  ;;  %v931_v3 = vsub.f32 %v923_v51, %v930_v20  ;;  %v961_v24 = vpop.xlane.xlu1 %960 }
 0x2b6   : > { %v842_v26 = vadd.f32 %v841_v18, %v840_v9  ;;  %v902_v27 = vadd.f32 %v901_v12, %v900_v10  ;;  %v962_v28 = vsub.f32 %v954_v16, %v961_v24  ;;  %v985_v61 = vadd.f32 %v984_v17, %v1794_v5 }
 0x2b7   : > { %v811_v29 = vrot.slane %v810_v52, 1  ;;  %v872_v30 = vrot.slane %v871_v22, 2  ;;  %v932_v15 = vrot.slane %v931_v3, 4  ;;  %v1016_v63 = vadd.f32 %v1015_v21, %v1801_v7 }
 0x2b8   : > { %v843_v25 = vrot.slane %v842_v26, 1  ;;  %v903_v31 = vrot.slane %v902_v27, 2  ;;  %v963_v19 = vrot.slane %v962_v28, 4  ;;  %v992_v23 = vpop.xlane.xlu0 %991 }
 0x2b9   : > { %v812_v32 = vadd.f32 %v811_v29, %v810_v52  ;;  %v873_v33 = vadd.f32 %v872_v30, %v871_v22  ;;  %v933_v34 = vadd.f32 %v932_v15, %v931_v3  ;;  %v993_v35 = vsub.f32 %v985_v61, %v992_v23  ;;  %v1023_v36 = vpop.xlane.xlu1 %1022 }
 0x2ba   : > { %v844_v37 = vadd.f32 %v843_v25, %v842_v26  ;;  %v904_v0 = vadd.f32 %v903_v31, %v902_v27  ;;  %v964_v38 = vadd.f32 %v963_v19, %v962_v28  ;;  %v1024_v39 = vsub.f32 %v1016_v63, %v1023_v36 }
 0x2bb   : > { %v814_v5 = vmul.f32 0.125, %v812_v32  ;;  %v874_v40 = vrot.slane %v873_v33, 1  ;;  %v934_v41 = vrot.slane %v933_v34, 2  ;;  %v994_v42 = vrot.slane %v993_v35, 4 }
 0x2bc   : > { %v845_v43 = vmul.f32 0.125, %v844_v37  ;;  %v905_v7 = vrot.slane %v904_v0, 1  ;;  %v965_v44 = vrot.slane %v964_v38, 2  ;;  %v1025_v47 = vrot.slane %v1024_v39, 4 }
 0x2bd   : > { %815 = vst [vmem:[%s1832_s6] sm:$0x1] %v814_v5  ;;  %v875_v48 = vadd.f32 %v874_v40, %v873_v33  ;;  %v935_v49 = vadd.f32 %v934_v41, %v933_v34  ;;  %v995_v50 = vadd.f32 %v994_v42, %v993_v35 }
 0x2be   : > { %846 = vst [vmem:[%s1832_s6 + $0x1] sm:$0x1] %v845_v43  ;;  %v906_v53 = vadd.f32 %v905_v7, %v904_v0  ;;  %v966_v54 = vadd.f32 %v965_v44, %v964_v38  ;;  %v1026_v55 = vadd.f32 %v1025_v47, %v1024_v39 }
 0x2bf   : > { %v876_v56 = vmul.f32 0.125, %v875_v48  ;;  %v936_v57 = vrot.slane %v935_v49, 1  ;;  %v996_v58 = vrot.slane %v995_v50, 2 }
 0x2c0   : > { %v907_v59 = vmul.f32 0.125, %v906_v53  ;;  %v967_v60 = vrot.slane %v966_v54, 1  ;;  %v1027_v62 = vrot.slane %v1026_v55, 2 }
 0x2c1   : > { %877 = vst [vmem:[%s1832_s6 + $0x2] sm:$0x1] %v876_v56  ;;  %v937_v1 = vadd.f32 %v936_v57, %v935_v49  ;;  %v997_v2 = vadd.f32 %v996_v58, %v995_v50 }
 0x2c2   : > { %908 = vst [vmem:[%s1832_s6 + $0x3] sm:$0x1] %v907_v59  ;;  %v968_v4 = vadd.f32 %v967_v60, %v966_v54  ;;  %v1028_v6 = vadd.f32 %v1027_v62, %v1026_v55 }
 0x2c3   : > { %v938_v45 = vmul.f32 0.125, %v937_v1  ;;  %v998_v8 = vrot.slane %v997_v2, 1 }
 0x2c4   : > { %v969_v9 = vmul.f32 0.125, %v968_v4  ;;  %v1029_v10 = vrot.slane %v1028_v6, 1 }
 0x2c5   : > { %939 = vst [vmem:[%s1832_s6 + $0x4] sm:$0x1] %v938_v45  ;;  %v999_v51 = vadd.f32 %v998_v8, %v997_v2 }
 0x2c6   : > { %970 = vst [vmem:[%s1832_s6 + $0x5] sm:$0x1] %v969_v9  ;;  %v1030_v11 = vadd.f32 %v1029_v10, %v1028_v6 }
 0x2c7   : > { %v1000_v13 = vmul.f32 0.125, %v999_v51 }
 0x2c8   : > { %v1031_v14 = vmul.f32 0.125, %v1030_v11 }
 0x2c9   : > { %1001 = vst [vmem:[%s1832_s6 + $0x6] sm:$0x1] %v1000_v13 }
 0x2ca   : > { %1032 = vst [vmem:[%s1832_s6 + $0x7] sm:$0x1] %v1031_v14 }
 0x2cb   : > { %1392 = shalt.err (!%p1389_p4)
}
 0x2cc   : > { %s1393_s21 = scalar_lea.hbm %s1845_s22, 128  ;;  %s1397_s12 = scalar_lea.hbm %s1895_s4, 256 }
 0x2cd   : > { %p1394_p0 = scmp.ne.s32.totalorder %s1845_s22, %s1393_s21  ;;  %p1398_p7 = scmp.lt.u32.totalorder %s1845_s22, %s1895_s4 }
 0x2ce   : > { %p1399_p8 = scmp.lt.u32.totalorder %s1397_s12, %s1393_s21  ;;  %p1401_p2 = scmp.lt.u32.totalorder %s1393_s21, %s1845_s22 }
 0x2cf   : > { %p1395_p1 = pnand %p1394_p0, %p1907_p6 }
 0x2d0   : > { %p1400_p9 = por %p1399_p8, %p1398_p7 }
 0x2d1   : > { %p1396_p5 = pneg %p1395_p1 }
 0x2d2   : > { %p1402_p10 = por %p1401_p2, %p1400_p9 }
 0x2d4   : > { %p1403_p13 = pnand %p1402_p10, %p1396_p5 }
 0x2d6   : > { %1406 = shalt.err (!%p1403_p13)
}
 0x2d7   : > { %1226 = dma.vmem_to_hbm [thread:$0]  (%p1907_p6), %s1847_s17, 128, %s1845_s22, %s1034_s23  }
 0x2d8 PF: > { %s1059_s9 = sand.u32 1, %s1439_s25   ;;  %p1908_p11 = scmp.ne.s32.totalorder %s1901_s11, 0 }
 0x2d9   : > { %p1909_p12 = scmp.ge.s32.totalorder %s1451_s28, 2  ;;  %s1060_s29 = scalar_lea.sflag [#allocation6], %s1059_s9 }
 0x2db   : > { %p1236_p3 = pnand %p1909_p12, %p1908_p11 }
 0x2dd   : > { %1434 = dma.done.wait (!%p1236_p3), %s1060_s29, 128  }
 0x2de   : > { %1436 = vsyncadd (!%p1236_p3), %s1060_s29, 4294967168  ;;  %p24_p4 = scmp.ge.s32.totalorder %s1522_s30, 4   ;;  %s1910_s25 = smov %s1443_s26 }
 0x2df   : > { %s1911_s26 = smov %s1447_s27  ;;  %s1912_s27 = smov %s1534_s7 }
 0x2e0   : > { %s1913_s28 = smov %s1522_s30  ;;  %26 = sbr.rel (!%p24_p4) target bundleno = 19 (0x13), region = 90 }
 0x2e7   :  { %1065 = vsyncpa [#allocation5], 1 }
 0x2e8   :  { %1067 = vsyncpa [#allocation5 + $0x1], 1 }
 0x2e9   :  { %1068 = vsyncpa [#allocation8], 1 }
 0x2ea   :  { %1070 = vsyncpa [#allocation8 + $0x1], 1 }
 0x2eb   :  { %1071 = vsyncpa [#allocation6], 1 }
 0x2ec   :  { %1073 = vsyncpa [#allocation6 + $0x1], 1 }

</bundles_post_ra>
